<compile_context>
chip_gen: v7x
topology: tpu7x:2x2x1
jax: 0.10.0
libtpu: 0.0.40
codegen_flags: <defaults>
</compile_context>

<pallas_src>
import jax
import jax.numpy as jnp
from jax.experimental import pallas as pl
from jax.experimental.pallas import tpu as pltpu


def _round_up(x: int, m: int) -> int:
    return (x + m - 1) // m * m


def _cdiv(a: int, b: int) -> int:
    return -(-a // b)


def weight_and_sum(feats, lin_w, lin_b, segment_ids, num_graphs, *,
                   compute_dtype=jnp.bfloat16, max_node_tile=None, graph_chunk=None):
    """feats: [N, F]; lin_w: [F, 1]; lin_b: scalar; segment_ids: [N] int; num_graphs: int."""
    N, F = feats.shape
    B = int(num_graphs)
    itemsize = jnp.dtype(feats.dtype).itemsize

    # ---- chip-aware VMEM budget & node-tile sizing --------------------------------
    try:
        vmem_cap = int(pltpu.get_tpu_info().vmem_capacity_bytes)
    except Exception:                                    # no-TPU / API fallback
        vmem_cap = 64 * 1024 * 1024                      # conservative: v7x per-core VMEM
    vmem_limit = int(min(max(32 * 1024 * 1024, int(vmem_cap * 0.55)),
                         96 * 1024 * 1024, vmem_cap))

    # feats double-buffer gets ~1/4 of the budget; TN multiple of 128 in [512, 8192].
    tn_target = (vmem_limit // 4) // (2 * max(F, 1) * itemsize) // 128 * 128
    tn_target = int(max(512, min(tn_target, 8192)))
    if max_node_tile is not None:
        tn_target = max(128, min(tn_target, int(max_node_tile) // 128 * 128))

    if N <= tn_target:
        # Single full-extent tile: block == array, no padding, no masking needed.
        TN, num_tiles, P, tiles_per_core = N, 1, 1, 1
    else:
        TN = tn_target
        num_tiles = _cdiv(N, TN)
        P = 2                                            # v7x: one node range per TensorCore
        tiles_per_core = _cdiv(num_tiles, P)
    total_tiles = P * tiles_per_core
    n_pad = total_tiles * TN                             # extent of seg / logits slabs
    need_mask = n_pad != N                               # ragged tail and/or phantom tile
    clamp_tiles = total_tiles != num_tiles               # odd tile count -> one phantom tile

    # ---- graph (B) chunking to bound onehot intermediates -------------------------
    b_pad8 = _round_up(B, 8)
    if graph_chunk is None:
        graph_chunk = max(8, min(b_pad8, (256 * 1024 // max(TN, 1)) // 8 * 8))
    BC = _round_up(max(8, min(int(graph_chunk), b_pad8)), 8)
    B_pad = _round_up(B, BC)
    num_bc = B_pad // BC

    # ---- tiny wrapper-side prep (no pass over feats itself) -----------------------
    w_row = lin_w.astype(jnp.float32).reshape(1, F)
    bias = jnp.asarray(lin_b, jnp.float32).reshape(1, 1)
    seg = segment_ids.astype(jnp.int32).reshape(1, N)
    if n_pad != N:
        seg = jnp.pad(seg, ((0, 0), (0, n_pad - N)), constant_values=-1)

    def kernel(b_ref, x_ref, w_ref, seg_ref, hsum_ref, aw_ref):
        # Zero this core's resident (B_pad, F) f32 accumulator on its first node tile.
        @pl.when(pl.program_id(1) == 0)
        def _():
            hsum_ref[...] = jnp.zeros_like(hsum_ref)

        x = x_ref[...]                                   # (TN, F), native dtype

        if need_mask:
            # Global node index >= N (ragged tail / phantom tile): zero the rows so any
            # garbage from the partial boundary DMA can't poison the matmuls.
            tile = pl.program_id(0) * tiles_per_core + pl.program_id(1)
            row = jax.lax.broadcasted_iota(jnp.int32, (TN, 1), 0)
            x = jnp.where(tile * TN + row < N, x, 0)

        # f32 logits (explainability output), lane-dense (1, TN).
        # (1,F) . (TN,F)^T is the attention-score contraction: the big tile is contracted
        # along its last (lane) dim, so no XLU transpose of (TN, F) is generated.
        logits = jax.lax.dot_general(
            w_ref[...], x.astype(jnp.float32),
            dimension_numbers=(((1,), (1,)), ((), ())),
            preferred_element_type=jnp.float32,
        ) + b_ref[0, 0]
        aw_ref[...] = logits

        w_sig = 1.0 / (1.0 + jnp.exp(-logits))           # exact sigmoid, (1, TN) f32
        x_c = x.astype(compute_dtype)                    # in-kernel cast for the MXU stream
        seg_ids = seg_ref[...]                           # (1, TN) int32; -1 = padding
        gid0 = jax.lax.broadcasted_iota(jnp.int32, (BC, TN), 0)

        def accumulate(c):
            # onehot_w[b, n] = sigmoid(logit_n) if seg_n == b else 0, graphs in chunk c.
            oh = jnp.where((gid0 + c * BC) == seg_ids, w_sig, 0.0).astype(compute_dtype)
            part = jnp.dot(oh, x_c, preferred_element_type=jnp.float32)   # (BC, F)
            if num_bc == 1:
                hsum_ref[...] += part
            else:
                g0 = pl.multiple_of(c * BC, BC)
                hsum_ref[pl.ds(g0, BC), :] += part

        if num_bc == 1:
            accumulate(0)
        else:
            def body(c, carry):
                accumulate(c)
                return carry
            jax.lax.fori_loop(0, num_bc, body, 0)

    def feats_index_map(p, i):
        t = p * tiles_per_core + i
        if clamp_tiles:                                  # phantom tile -> re-read the last real
            t = jnp.minimum(t, num_tiles - 1)            # tile; its rows are masked to zero
        return (t, 0)

    hsum, aw = pl.pallas_call(
        kernel,
        out_shape=(
            jax.ShapeDtypeStruct((P, B_pad, F), jnp.float32),   # per-core partial sums
            jax.ShapeDtypeStruct((1, n_pad), jnp.float32),      # lane-dense logits slab
        ),
        grid=(P, tiles_per_core),
        in_specs=[
            pl.BlockSpec((1, 1), lambda p, i: (0, 0),
                         memory_space=pltpu.MemorySpace.SMEM),  # bias scalar
            pl.BlockSpec((TN, F), feats_index_map),             # feats tile (pipelined, native dtype)
            pl.BlockSpec((1, F), lambda p, i: (0, 0)),          # linear weight row
            pl.BlockSpec((1, TN), lambda p, i: (0, p * tiles_per_core + i)),   # segment ids
        ],
        out_specs=(
            pl.BlockSpec((None, B_pad, F), lambda p, i: (p, 0, 0)),            # resident accumulator
            pl.BlockSpec((1, TN), lambda p, i: (0, p * tiles_per_core + i)),   # logits slab
        ),
        compiler_params=pltpu.CompilerParams(
            dimension_semantics=("parallel", "arbitrary"),      # core split x node reduction
            vmem_limit_bytes=vmem_limit,
        ),
    )(bias, feats, w_row, seg)

    h_g_sum = jnp.sum(hsum, axis=0)[:B, :].astype(feats.dtype)
    atom_weights = aw[0, :N].reshape(N, 1).astype(feats.dtype)  # pre-sigmoid logits, [N, 1]
    return h_g_sum, atom_weights


if __name__ == "__main__":
    key = jax.random.PRNGKey(0)

    # ---- test 1: module-scale shapes (single full-extent tile path) ---------------
    in_feats, num_nodes, num_graphs = 32, 8, 2
    k_x, k_w, k_b, k2 = jax.random.split(key, 4)
    feats = jax.random.normal(k_x, (num_nodes, in_feats), dtype=jnp.float32)
    lin_w = jax.random.normal(k_w, (in_feats, 1), dtype=jnp.float32) * 0.1
    lin_b = jax.random.normal(k_b, (), dtype=jnp.float32) * 0.1
    # Graph 0 owns nodes 0..4, graph 1 owns nodes 5..7.
    segment_ids = jnp.array([0, 0, 0, 0, 0, 1, 1, 1], dtype=jnp.int32)

    h_g_sum, atom_weights = weight_and_sum(feats, lin_w, lin_b, segment_ids, num_graphs)
    jax.block_until_ready((h_g_sum, atom_weights))

    logits_ref = feats @ lin_w + lin_b
    w_ref = jax.nn.sigmoid(logits_ref)
    seg_oh = (segment_ids[None, :] == jnp.arange(num_graphs)[:, None]).astype(jnp.float32)
    hsum_ref = seg_oh @ (feats * w_ref)

    assert h_g_sum.shape == (num_graphs, in_feats)
    assert atom_weights.shape == (num_nodes, 1)
    assert jnp.allclose(atom_weights, logits_ref, atol=5e-2, rtol=5e-2)
    assert jnp.allclose(h_g_sum, hsum_ref, atol=5e-2, rtol=5e-2)

    # ---- test 2: exercise the tiled path (multi-tile, 2-way core split, phantom tile,
    # ragged-tail mask, graph chunking) with forced small tile sizes -----------------
    N2, F2, B2 = 2400, 64, 20
    k_x2, k_w2, k_b2, k_s2 = jax.random.split(k2, 4)
    feats2 = jax.random.normal(k_x2, (N2, F2), dtype=jnp.float32)
    lin_w2 = jax.random.normal(k_w2, (F2, 1), dtype=jnp.float32) * 0.1
    lin_b2 = jax.random.normal(k_b2, (), dtype=jnp.float32) * 0.1
    seg2 = jax.random.randint(k_s2, (N2,), 0, B2, dtype=jnp.int32)

    h2, aw2 = weight_and_sum(feats2, lin_w2, lin_b2, seg2, B2,
                             max_node_tile=512, graph_chunk=8)
    jax.block_until_ready((h2, aw2))

    logits2_ref = feats2 @ lin_w2 + lin_b2
    w2_ref = jax.nn.sigmoid(logits2_ref)
    oh2 = (seg2[None, :] == jnp.arange(B2)[:, None]).astype(jnp.float32)
    h2_ref = oh2 @ (feats2 * w2_ref)

    assert jnp.allclose(aw2, logits2_ref, atol=5e-2, rtol=5e-2)
    assert jnp.allclose(h2, h2_ref, atol=5e-2, rtol=5e-2)

    print("KERNEL_OK")
</pallas_src>

<mosaic_0001>
module attributes {stable_mosaic.version = 11 : i64} {
  func.func @kernel(%arg0: i32, %arg1: i32, %arg2: memref<1x1xf32, #tpu.memory_space<smem>>, %arg3: memref<8x32xf32, #tpu.memory_space<vmem>>, %arg4: memref<1x32xf32, #tpu.memory_space<vmem>>, %arg5: memref<1x8xi32, #tpu.memory_space<vmem>>, %arg6: memref<1x8x32xf32, #tpu.memory_space<vmem>>, %arg7: memref<1x8xf32, #tpu.memory_space<vmem>>) attributes {dimension_semantics = [#tpu.dimension_semantics<parallel>, #tpu.dimension_semantics<arbitrary>], iteration_bounds = array<i64: 1, 1>, scalar_prefetch = 0 : i64, scratch_operands = 0 : i64, tpu.core_type = #tpu.core_type<tc>, window_params = [{transform_indices = @transform_0, window_bounds = array<i64: 1, 1>}, {transform_indices = @transform_1, window_bounds = array<i64: 8, 32>}, {pipeline_mode = #tpu.pipeline_mode<synchronous>, transform_indices = @transform_2, window_bounds = array<i64: 1, 32>}, {transform_indices = @transform_3, window_bounds = array<i64: 1, 8>}, {transform_indices = @transform_4, window_bounds = array<i64: 1, 8, 32>}, {transform_indices = @transform_5, window_bounds = array<i64: 1, 8>}]} {
    %c0_i32 = arith.constant 0 : i32
    %0 = arith.cmpi eq, %arg1, %c0_i32 : i32
    %1 = arith.extui %0 : i1 to i32
    %c0_i32_0 = arith.constant 0 : i32
    %2 = arith.cmpi ne, %1, %c0_i32_0 : i32
    scf.if %2 {
      %cst_22 = arith.constant 0.000000e+00 : f32
      %36 = vector.broadcast %cst_22 : f32 to vector<8x32xf32>
      %c0_23 = arith.constant 0 : index
      %c0_24 = arith.constant 0 : index
      %c0_25 = arith.constant 0 : index
      %37 = vector.load %arg6[%c0_23, %c0_24, %c0_25] : memref<1x8x32xf32, #tpu.memory_space<vmem>>, vector<1x8x32xf32>
      %38 = vector.shape_cast %37 : vector<1x8x32xf32> to vector<8x32xf32>
      %39 = vector.shape_cast %36 : vector<8x32xf32> to vector<1x8x32xf32>
      tpu.vector_store %arg6[%c0_23, %c0_24, %c0_25], %39 {strides = array<i32>} : memref<1x8x32xf32, #tpu.memory_space<vmem>>, vector<1x8x32xf32>,
    } else {
    }
    %c0 = arith.constant 0 : index
    %c0_1 = arith.constant 0 : index
    %3 = vector.load %arg3[%c0, %c0_1] : memref<8x32xf32, #tpu.memory_space<vmem>>, vector<8x32xf32>
    %c0_2 = arith.constant 0 : index
    %c0_3 = arith.constant 0 : index
    %4 = vector.load %arg4[%c0_2, %c0_3] : memref<1x32xf32, #tpu.memory_space<vmem>>, vector<1x32xf32>
    %cst = arith.constant dense<0.000000e+00> : vector<1x8xf32>
    %5 = tpu.matmul %4, %3, %cst {dimension_numbers = #tpu.dot_dimension_numbers<[1], [1], [0], [0], [0, 0, 1, 0], [], []>} : vector<1x32xf32>, vector<8x32xf32>, vector<1x8xf32> -> vector<1x8xf32>
    %c0_4 = arith.constant 0 : index
    %c0_5 = arith.constant 0 : index
    %6 = memref.load %arg2[%c0_4, %c0_5] : memref<1x1xf32, #tpu.memory_space<smem>>
    %7 = vector.broadcast %6 : f32 to vector<1x8xf32>
    %8 = arith.addf %5, %7 : vector<1x8xf32>
    %c0_6 = arith.constant 0 : index
    %c0_7 = arith.constant 0 : index
    %9 = vector.load %arg7[%c0_6, %c0_7] : memref<1x8xf32, #tpu.memory_space<vmem>>, vector<1x8xf32>
    tpu.vector_store %arg7[%c0_6, %c0_7], %8 {strides = array<i32>} : memref<1x8xf32, #tpu.memory_space<vmem>>, vector<1x8xf32>,
    %cst_8 = arith.constant 0.000000e+00 : f32
    %10 = vector.broadcast %cst_8 : f32 to vector<1x8xf32>
    %11 = arith.subf %10, %8 : vector<1x8xf32>
    %12 = math.exp %11 : vector<1x8xf32>
    %cst_9 = arith.constant 1.000000e+00 : f32
    %13 = vector.broadcast %cst_9 : f32 to vector<1x8xf32>
    %14 = arith.addf %13, %12 : vector<1x8xf32>
    %cst_10 = arith.constant 1.000000e+00 : f32
    %15 = vector.broadcast %cst_10 : f32 to vector<1x8xf32>
    %16 = arith.divf %15, %14 : vector<1x8xf32>
    %17 = arith.truncf %3 : vector<8x32xf32> to vector<8x32xbf16>
    %c0_11 = arith.constant 0 : index
    %c0_12 = arith.constant 0 : index
    %18 = vector.load %arg5[%c0_11, %c0_12] : memref<1x8xi32, #tpu.memory_space<vmem>>, vector<1x8xi32>
    %19 = tpu.iota {dimensions = array<i32: 0>} : vector<8x8xi32>
    %c0_i32_13 = arith.constant 0 : i32
    %20 = vector.broadcast %c0_i32_13 : i32 to vector<8x8xi32>
    %21 = arith.addi %19, %20 : vector<8x8xi32>
    %22 = vector.broadcast %18 : vector<1x8xi32> to vector<8x8xi32>
    %23 = arith.cmpi eq, %21, %22 : vector<8x8xi32>
    %cst_14 = arith.constant 0.000000e+00 : f32
    %24 = vector.shape_cast %16 : vector<1x8xf32> to vector<1x8xf32>
    %25 = vector.broadcast %24 : vector<1x8xf32> to vector<8x8xf32>
    %26 = vector.broadcast %cst_14 : f32 to vector<8x8xf32>
    %27 = arith.select %23, %25, %26 : vector<8x8xi1>, vector<8x8xf32>
    %28 = arith.truncf %27 : vector<8x8xf32> to vector<8x8xbf16>
    %cst_15 = arith.constant dense<0.000000e+00> : vector<8x32xf32>
    %29 = tpu.matmul %28, %17, %cst_15 {dimension_numbers = #tpu.dot_dimension_numbers<[1], [0], [0], [1], [0, 0, 1, 1], [], []>} : vector<8x8xbf16>, vector<8x32xbf16>, vector<8x32xf32> -> vector<8x32xf32>
    %c0_16 = arith.constant 0 : index
    %c0_17 = arith.constant 0 : index
    %c0_18 = arith.constant 0 : index
    %30 = vector.load %arg6[%c0_16, %c0_17, %c0_18] : memref<1x8x32xf32, #tpu.memory_space<vmem>>, vector<1x8x32xf32>
    %31 = vector.shape_cast %30 : vector<1x8x32xf32> to vector<8x32xf32>
    %32 = arith.addf %31, %29 : vector<8x32xf32>
    %c0_19 = arith.constant 0 : index
    %c0_20 = arith.constant 0 : index
    %c0_21 = arith.constant 0 : index
    %33 = vector.load %arg6[%c0_19, %c0_20, %c0_21] : memref<1x8x32xf32, #tpu.memory_space<vmem>>, vector<1x8x32xf32>
    %34 = vector.shape_cast %33 : vector<1x8x32xf32> to vector<8x32xf32>
    %35 = vector.shape_cast %32 : vector<8x32xf32> to vector<1x8x32xf32>
    tpu.vector_store %arg6[%c0_19, %c0_20, %c0_21], %35 {strides = array<i32>} : memref<1x8x32xf32, #tpu.memory_space<vmem>>, vector<1x8x32xf32>,
    return
  }
  func.func @transform_0(%arg0: i32, %arg1: i32) -> (i32, i32) {
    %c0_i32 = arith.constant 0 : i32
    %c0_i32_0 = arith.constant 0 : i32
    %c0_i32_1 = arith.constant 0 : i32
    return %c0_i32, %c0_i32_0 : i32, i32
  }
  func.func @transform_1(%arg0: i32, %arg1: i32) -> (i32, i32) {
    %c1_i32 = arith.constant 1 : i32
    %0 = arith.muli %arg0, %c1_i32 : i32
    %1 = arith.addi %0, %arg1 : i32
    %c0_i32 = arith.constant 0 : i32
    %c0_i32_0 = arith.constant 0 : i32
    return %1, %c0_i32 : i32, i32
  }
  func.func @transform_2(%arg0: i32, %arg1: i32) -> (i32, i32) {
    %c0_i32 = arith.constant 0 : i32
    %c0_i32_0 = arith.constant 0 : i32
    %c0_i32_1 = arith.constant 0 : i32
    return %c0_i32, %c0_i32_0 : i32, i32
  }
  func.func @transform_3(%arg0: i32, %arg1: i32) -> (i32, i32) {
    %c1_i32 = arith.constant 1 : i32
    %0 = arith.muli %arg0, %c1_i32 : i32
    %1 = arith.addi %0, %arg1 : i32
    %c0_i32 = arith.constant 0 : i32
    %c0_i32_0 = arith.constant 0 : i32
    return %c0_i32, %1 : i32, i32
  }
  func.func @transform_4(%arg0: i32, %arg1: i32) -> (i32, i32, i32) {
    %c0_i32 = arith.constant 0 : i32
    %c0_i32_0 = arith.constant 0 : i32
    %c0_i32_1 = arith.constant 0 : i32
    return %arg0, %c0_i32, %c0_i32_0 : i32, i32, i32
  }
  func.func @transform_5(%arg0: i32, %arg1: i32) -> (i32, i32) {
    %c1_i32 = arith.constant 1 : i32
    %0 = arith.muli %arg0, %c1_i32 : i32
    %1 = arith.addi %0, %arg1 : i32
    %c0_i32 = arith.constant 0 : i32
    %c0_i32_0 = arith.constant 0 : i32
    return %c0_i32, %1 : i32, i32
  }
}

</mosaic_0001>

<bundles_post_ra>
// kernel: tpu_custom_call.1
= control target key start
LH: loop header
LB: loop body
LE: loop exit
PB: predicated region body
PF: predicated region fallthrough
CT: control target
= control target key end

     0   :  { %12 = vsyncpa [#allocation4], 0  ;;  %s434_s0 = inlined_call_operand.<no memory space> [shape: f32[1,1], index: 0, kind: input, shape index: {}]   ;;  %s435_s1 = inlined_call_operand.hbm [shape: f32[8,32], index: 1, kind: input, shape index: {}]   ;;  %s436_s2 = inlined_call_operand.vmem [shape: f32[1,32], index: 2, kind: input, shape index: {}]   ;;  %s437_s3 = inlined_call_operand.vmem [shape: s32[1,8], index: 3, kind: input, shape index: {}]   ;;  %s438_s4 = inlined_call_operand.hbm [shape: f32[1,8,32], index: 4, kind: output, shape index: {0}]   ;;  %s439_s5 = inlined_call_operand.hbm [shape: f32[1,8], index: 5, kind: output, shape index: {1}]  }
   0x1   :  { %13 = vsyncpa [#allocation5], 0 }
   0x2   :  { %14 = vsyncpa [#allocation8], 0  ;;  %s350_s18 = smov [#allocation3]   ;;  %s278_s22 = scalar_lea.hbm %s435_s1, 128 }
   0x3   :  { %s26_s19 = sshll.u32 %s350_s18, 4  ;;  %p279_p0 = scmp.ne.s32.totalorder %s435_s1, %s278_s22  ;;  %s27_s19 = int_to_ptr.vmem [resolvable:$true] %s26_s19 }
   0x4   :  { %p282_p1 = scmp.lt.u32.totalorder %s278_s22, %s435_s1 }
   0x6   :  { %p284_p2 = pnand %p282_p1, %p279_p0 }
   0x8   :  { %287 = shalt.err (!%p284_p2)
}
   0x9   :  { %s288_s27 = scalar_lea.vmem %s27_s19, 128  ;;  %p293_p4 = scmp.lt.s32.totalorder %s27_s19, %s27_s19 }
   0xa   :  { %p289_p3 = scmp.ne.s32.totalorder %s27_s19, %s288_s27  ;;  %p294_p5 = scmp.lt.s32.totalorder %s288_s27, %s288_s27 }
   0xc   :  { %p295_p6 = por %p294_p5, %p293_p4 }
   0xe   :  { %p296_p7 = pnand %p295_p6, %p289_p3 }
  0x10   :  { %299 = shalt.err (!%p296_p7)
}
  0x11   :  { %29 = dma.hbm_to_vmem [thread:$0]  %s435_s1, 128, %s27_s19, [#allocation4]  }
  0x12   :  { %344 = dma.done.wait [#allocation4], 128  }
  0x13   :  { %345 = vsyncadd [#allocation4], 4294967168  ;;  %vm58_vm0 = vcmask 261120   ;;  %v351_v0 = vmov 0.0   ;;  %vm352_vm1 = vmmov 0   ;;  %v60_v1 = vld [vmem:[#allocation3] sm:$0xff]  ;;  %v63_v5 = vstv %s434_s0 }
  0x14   :  { %258 = vmatprep.subr.mxu0 %v351_v0  ;;  %59 = vst.msk [vmem:[#allocation6] sm:$0xff] %vm58_vm0, %v351_v0  ;;  %260 = vmatprep.mubr.msk.f32.mxu0 %vm352_vm1, %v351_v0  ;;  %v61_v2 = vld [vmem:[%s436_s2] sm:$0x1]  ;;  %v149_v3 = vpack.c.bf16 %v60_v1, %v60_v1  ;;  %vm168_vm2 = vcmask 1043456   ;;  %vm141_vm3 = vcmask 57344   ;;  %v151_v13 = vlaneseq  ;;  %s353_s0 = smov [#allocation7]  }
  0x15   :  { %263 = vmatprep.subr.bf16.mxu1 %v351_v0  ;;  %265 = vmatprep.mubr.msk.bf16.mxu1 %vm352_vm1, %v351_v0  ;;  %v252_v15 = vld [vmem:[%s437_s3] ss:$0 sm:$0xff]  ;;  %vm164_vm5 = vcmask 64512   ;;  %s234_s9 = sshll.u32 %s353_s0, 4  ;;  %s235_s9 = int_to_ptr.vmem [resolvable:$true] %s234_s9 }
  0x16   :  { %259 = vmatpush3.xpose.msk.msra.mxu0 %vm58_vm0, %v60_v1  ;;  %v170_v4 = vsel %vm168_vm2, %v149_v3, 0  ;;  %v152_v14 = vshrl.u32 %v151_v13, 7  ;;  %s300_s10 = scalar_lea.vmem %s235_s9, 16  ;;  %s304_s11 = scalar_lea.vmem %s235_s9, 32 }
  0x17   :  { %264 = vmatpush3.bf16.msra.mxu1 %v170_v4  ;;  %p301_p8 = scmp.ne.s32.totalorder %s235_s9, %s300_s10  ;;  %p305_p9 = scmp.lt.s32.totalorder %s235_s9, %s235_s9 }
  0x18   :  { %v160_v16 = vsub.s32 0, %v152_v14  ;;  %vm157_vm4 = vcmp.eq.s32.totalorder %v152_v14, %v252_v15  ;;  %p306_p10 = scmp.lt.s32.totalorder %s304_s11, %s300_s10 }
  0x19   :  { %261 = vmatmul.mubr.msk.f32.vlgmr.msra.gmra.mrb[0].mxu0 %vm58_vm0, %v61_v2 }
  0x1a   :  { %p307_p11 = por %p306_p10, %p305_p9 }
  0x1c   :  { %p308_p12 = pnand %p307_p11, %p301_p8 }
  0xec   :  { %v137_v6 = vpop.f32.mrb[0].mxu0 }
  0xed   :  { %v138_v7 = vadd.f32 %v137_v6, %v63_v5  ;;  %v262_v8 = vpop.f32.mrb[1].mxu0 }
  0xef   :  { %v143_v9 = vsub.f32 0.0, %v138_v7  ;;  %142 = vst.msk [vmem:[#allocation7] sm:$0x1] %vm141_vm3, %v138_v7 }
  0xf1   :  { %v144_v10 = vmul.f32 1.442695, %v143_v9 }
  0xf3   :  { %274 = vpow2.f32 %v144_v10 }
  0xfd   :  { %v275_v11 = vpop.eup %274 }
  0xfe   :  { %v146_v12 = vadd.f32 1.0, %v275_v11 }
 0x100   :  { %276 = vrcp.f32 %v146_v12 }
 0x10a   :  { %v277_v17 = vpop.eup %276 }
 0x10b   :  { %v161_v18 = vrot.slane %v277_v17, %v160_v16 }
 0x10d   :  { %v162_v19 = vsel %vm157_vm4, %v161_v18, 0.0 }
 0x10e   :  { %v163_v20 = vpack.c.bf16 %v162_v19, %v162_v19 }
 0x110   :  { %266 = vmatmul.mubr.msk.bf16.vlgmr.msra.gmra.mrb[0].mxu1 %vm164_vm5, %v163_v20 }
 0x111   :  { %311 = shalt.err (!%p308_p12)
}
 0x112   :  { %s312_s13 = scalar_lea.hbm %s439_s5, 16 }
 0x113   :  { %p313_p13 = scmp.ne.s32.totalorder %s439_s5, %s312_s13  ;;  %p316_p0 = scmp.lt.u32.totalorder %s312_s13, %s439_s5 }
 0x115   :  { %p318_p1 = pnand %p316_p0, %p313_p13 }
 0x117   :  { %321 = shalt.err (!%p318_p1)
}
 0x118   :  { %237 = dma.vmem_to_hbm [thread:$0]  %s235_s9, 16, %s439_s5, [#allocation8]   ;;  %v212_v21 = vld [vmem:[#allocation6] sm:$0xff] }
 0x119   :  { %s354_s20 = smov [#allocation6]  }
 0x11a   :  { %s221_s21 = sshll.u32 %s354_s20, 4  ;;  %s222_s21 = int_to_ptr.vmem [resolvable:$true] %s221_s21 }
 0x11b   :  { %s322_s22 = scalar_lea.vmem %s222_s21, 128  ;;  %p327_p3 = scmp.lt.s32.totalorder %s222_s21, %s222_s21 }
 0x11c   :  { %p323_p2 = scmp.ne.s32.totalorder %s222_s21, %s322_s22  ;;  %p328_p4 = scmp.lt.s32.totalorder %s322_s22, %s322_s22 }
 0x11e   :  { %p329_p5 = por %p328_p4, %p327_p3 }
 0x120   :  { %p330_p6 = pnand %p329_p5, %p323_p2 }
 0x1e3   :  { %v206_v22 = vpop.f32.mrb[0].mxu1 }
 0x1e4   :  { %v213_v23 = vadd.f32 %v212_v21, %v206_v22  ;;  %v267_v24 = vpop.f32.mrb[1].mxu1 }
 0x1e5   :  { %v209_v25 = vpop.f32.mrb[2].mxu1 }
 0x1e6   :  { %214 = vst.msk [vmem:[#allocation6] sm:$0xff] %vm58_vm0, %v213_v23  ;;  %v268_v26 = vpop.f32.mrb[3].mxu1 }
 0x1e7   :  { %333 = shalt.err (!%p330_p6)
}
 0x1e8   :  { %s334_s24 = scalar_lea.hbm %s438_s4, 128 }
 0x1e9   :  { %p335_p7 = scmp.ne.s32.totalorder %s438_s4, %s334_s24  ;;  %p338_p8 = scmp.lt.u32.totalorder %s334_s24, %s438_s4 }
 0x1eb   :  { %p340_p9 = pnand %p338_p8, %p335_p7 }
 0x1ed   :  { %343 = shalt.err (!%p340_p9)
}
 0x1ee   :  { %224 = dma.vmem_to_hbm [thread:$0]  %s222_s21, 128, %s438_s4, [#allocation5]  }
 0x1ef   :  { %346 = dma.done.wait [#allocation5], 128  }
 0x1f0   :  { %347 = vsyncadd [#allocation5], 4294967168 }
 0x1f1   :  { %348 = dma.done.wait [#allocation8], 16  }
 0x1f2   :  { %349 = vsyncadd [#allocation8], 4294967280 }
 0x1f3   :  { %244 = vsyncpa [#allocation4], 1 }
 0x1f4   :  { %245 = vsyncpa [#allocation5], 1 }
 0x1f5   :  { %246 = vsyncpa [#allocation8], 1 }

</bundles_post_ra>
